<compile_context>
chip_gen: v7x
topology: tpu7x:2x2x1
jax: 0.10.0
libtpu: 0.0.40
codegen_flags: <defaults>
</compile_context>

<pallas_src>
import math

import jax
import jax.numpy as jnp
from jax.experimental import pallas as pl
from jax.experimental.pallas import tpu as pltpu


def _encode(pos_ref, a_ref, phase_ref):
    """sin(pos @ A + phase); the (tile_m, k) x (k, width) block-diagonal product
    is unrolled into k exact f32 broadcast multiply-adds (k small, static)."""
    k = pos_ref.shape[-1]
    pos = pos_ref[...]
    a = a_ref[...]
    s = pos[:, 0:1] * a[0:1, :]
    for i in range(1, k):
        s = s + pos[:, i:i + 1] * a[i:i + 1, :]
    return jnp.sin(s + phase_ref[...])


def _pe_rel_kernel(pos_ref, a_rel_ref, phase_ref, out_ref):
    out_ref[...] = _encode(pos_ref, a_rel_ref, phase_ref)


def _pe_rel_doy_kernel(pos_ref, doy_ref, a_rel_ref, a_doy_ref, phase_ref, out_ref):
    out_ref[...] = (_encode(pos_ref, a_rel_ref, phase_ref)
                    + _encode(doy_ref, a_doy_ref, phase_ref))


_TARGET_BLOCK_BYTES = 8 << 20   # ~8 MiB f32 output block
_MIN_PIPELINE_BYTES = 1 << 20   # below this a single block (nothing worth hiding)
_MIN_STEPS = 4                  # >=2 steps per TensorCore on v7x megacore


def _choose_tile_m(m, width):
    """Pick the sublane tile so blocks are ~8 MiB and the grid has >=4 steps
    whenever the output is big enough to benefit from write-back pipelining."""
    total = m * width * 4
    if m < 64 or total <= _MIN_PIPELINE_BYTES:
        return m
    steps = max(_MIN_STEPS, pl.cdiv(total, _TARGET_BLOCK_BYTES))
    tile = pl.cdiv(m, steps)
    tile = max(8, ((tile + 7) // 8) * 8)
    return m if tile >= m else tile


class PositionalEncoderPallas:
    def __init__(self, d, T=1000, repeat=None, offset=0):
        self.d = d
        self.T_rel = T
        self.T_doy = 1000
        self.repeat = repeat
        self.offset = offset
        idx = jnp.arange(offset, offset + d, dtype=jnp.float32)
        expo = 2.0 * jnp.floor(idx / 2.0) / d
        self.denom_rel = jnp.power(jnp.float32(self.T_rel), expo)   # (d,)
        self.denom_doy = jnp.power(jnp.float32(self.T_doy), expo)   # (d,)
        # Host-side reciprocals -> single VPU multiply in-kernel.
        self._inv_rel = 1.0 / self.denom_rel
        self._inv_doy = 1.0 / self.denom_doy
        # cos(x) = sin(x + pi/2): phase encodes the sin/cos parity of each column.
        self._phase = (jnp.arange(d) % 2).astype(jnp.float32) * jnp.float32(math.pi / 2.0)
        self._const_cache = {}   # k -> (a_rel, a_doy, phase)
        self._call_cache = {}    # (m, k, width, has_doys) -> pallas_call callable

    # -- cached packed constants -------------------------------------------
    def _constants(self, k, rep):
        cached = self._const_cache.get(k)
        if cached is not None:
            return cached
        w = self.d * rep
        width = k * w
        inv_rel_w = jnp.tile(self._inv_rel, rep)   # repeat fused into lane axis
        inv_doy_w = jnp.tile(self._inv_doy, rep)
        phase_w = jnp.tile(self._phase, rep)
        if k == 1:
            a_rel = inv_rel_w.reshape(1, width)
            a_doy = inv_doy_w.reshape(1, width)
        else:
            eye = jnp.eye(k, dtype=jnp.float32)
            a_rel = (eye[:, :, None] * inv_rel_w[None, None, :]).reshape(k, width)
            a_doy = (eye[:, :, None] * inv_doy_w[None, None, :]).reshape(k, width)
        phase = jnp.tile(phase_w, k).reshape(1, width)
        out = (jax.device_put(a_rel), jax.device_put(a_doy), jax.device_put(phase))
        self._const_cache[k] = out
        return out

    # -- cached pallas_call construction ------------------------------------
    def _get_kernel(self, m, k, width, has_doys):
        key = (m, k, width, has_doys)
        fn = self._call_cache.get(key)
        if fn is not None:
            return fn

        tile_m = _choose_tile_m(m, width)
        grid = (pl.cdiv(m, tile_m),)
        row_spec = pl.BlockSpec((tile_m, k), lambda i: (i, 0))
        const_spec = lambda r: pl.BlockSpec((r, width), lambda i: (0, 0))
        out_spec = pl.BlockSpec((tile_m, width), lambda i: (i, 0))
        out_shape = jax.ShapeDtypeStruct((m, width), jnp.float32)
        cparams = pltpu.CompilerParams(
            dimension_semantics=("parallel",),
            vmem_limit_bytes=48 * 1024 * 1024)

        if has_doys:
            cost = pl.CostEstimate(
                flops=int(m * width * (4 * k + 3)),
                transcendentals=int(2 * m * width),
                bytes_accessed=int(4 * (m * width + 2 * (m * k + k * width) + width)))
            fn = pl.pallas_call(
                _pe_rel_doy_kernel,
                out_shape=out_shape,
                grid=grid,
                in_specs=[row_spec, row_spec, const_spec(k), const_spec(k), const_spec(1)],
                out_specs=out_spec,
                compiler_params=cparams,
                cost_estimate=cost)
        else:
            cost = pl.CostEstimate(
                flops=int(m * width * (2 * k + 1)),
                transcendentals=int(m * width),
                bytes_accessed=int(4 * (m * width + m * k + k * width + width)))
            fn = pl.pallas_call(
                _pe_rel_kernel,
                out_shape=out_shape,
                grid=grid,
                in_specs=[row_spec, const_spec(k), const_spec(1)],
                out_specs=out_spec,
                compiler_params=cparams,
                cost_estimate=cost)
        self._call_cache[key] = fn
        return fn

    # -- forward -------------------------------------------------------------
    def __call__(self, batch_positions, doys=None):
        B, T = batch_positions.shape
        N = B * T
        rep = 1 if self.repeat is None else self.repeat
        w_out = self.d * rep

        # Generalized lane packing: pack k logical rows per physical row so the
        # packed width k*w_out is a multiple of 128 (always unmasked stores).
        k = 128 // math.gcd(w_out, 128)
        if k > 16 or N % k != 0:
            k = 1
        m = N // k
        width = k * w_out

        a_rel, a_doy, phase = self._constants(k, rep)
        pos = batch_positions.astype(jnp.float32).reshape(m, k)
        fn = self._get_kernel(m, k, width, doys is not None)

        if doys is None:
            packed = fn(pos, a_rel, phase)
        else:
            doy = doys.astype(jnp.float32).reshape(m, k)
            packed = fn(pos, doy, a_rel, a_doy, phase)

        # (m, k*W) row-major is exactly (N, W) row-major: pure metadata reshape.
        return packed.reshape(B, T, w_out)


def _reference(batch_positions, doys, d, T_rel, repeat, offset):
    """Faithful JAX port of the PyTorch module (division + parity sin/cos + concat)."""
    idx = jnp.arange(offset, offset + d, dtype=jnp.float32)
    expo = 2.0 * jnp.floor(idx / 2.0) / d
    denom_rel = jnp.power(jnp.float32(T_rel), expo)
    denom_doy = jnp.power(jnp.float32(1000.0), expo)

    def enc(p, denom):
        s = p.astype(jnp.float32)[:, :, None] / denom[None, None, :]
        parity = (jnp.arange(d) % 2)[None, None, :]
        return jnp.where(parity == 0, jnp.sin(s), jnp.cos(s))

    out = enc(batch_positions, denom_rel)
    if doys is not None:
        out = out + enc(doys, denom_doy)
    if repeat is not None:
        out = jnp.concatenate([out for _ in range(repeat)], axis=-1)
    return out


if __name__ == "__main__":
    key = jax.random.PRNGKey(0)
    k1, k2 = jax.random.split(key)
    B, T = 2, 8
    batch_positions = jax.random.randint(k1, (B, T), 0, 365).astype(jnp.float32)
    doys = jax.random.randint(k2, (B, T), 0, 365).astype(jnp.float32)

    # Case 1: d=32, rel + doy (lane-packed path, k = 4).
    pe = PositionalEncoderPallas(d=32, T=1000, repeat=None, offset=0)
    out = jax.block_until_ready(pe(batch_positions, doys))
    ref = _reference(batch_positions, doys, 32, 1000, None, 0)
    assert out.shape == (B, T, 32)
    assert jnp.allclose(out, ref, atol=5e-4, rtol=5e-4), float(jnp.max(jnp.abs(out - ref)))

    # Case 2: d=32, rel only, repeat=2 fused into the kernel output (k = 2).
    pe2 = PositionalEncoderPallas(d=32, T=1000, repeat=2, offset=0)
    out2 = jax.block_until_ready(pe2(batch_positions, None))
    ref2 = _reference(batch_positions, None, 32, 1000, 2, 0)
    assert out2.shape == (B, T, 64)
    assert jnp.allclose(out2, ref2, atol=5e-4, rtol=5e-4), float(jnp.max(jnp.abs(out2 - ref2)))

    # Case 3: d=128 with offset (already lane-dense, k = 1 broadcast path).
    pe3 = PositionalEncoderPallas(d=128, T=10000, repeat=None, offset=4)
    out3 = jax.block_until_ready(pe3(batch_positions, doys))
    ref3 = _reference(batch_positions, doys, 128, 10000, None, 4)
    assert out3.shape == (B, T, 128)
    assert jnp.allclose(out3, ref3, atol=5e-4, rtol=5e-4), float(jnp.max(jnp.abs(out3 - ref3)))

    # Case 4 (repeat call, cached constants + cached pallas_call): same result.
    out_again = jax.block_until_ready(pe(batch_positions, doys))
    assert jnp.allclose(out_again, ref, atol=5e-4, rtol=5e-4)

    print("KERNEL_OK")
</pallas_src>

<mosaic_0001>
module attributes {stable_mosaic.version = 11 : i64} {
  func.func @_pe_rel_doy_kernel(%arg0: i32, %arg1: memref<4x4xf32, #tpu.memory_space<vmem>>, %arg2: memref<4x4xf32, #tpu.memory_space<vmem>>, %arg3: memref<4x128xf32, #tpu.memory_space<vmem>>, %arg4: memref<4x128xf32, #tpu.memory_space<vmem>>, %arg5: memref<1x128xf32, #tpu.memory_space<vmem>>, %arg6: memref<4x128xf32, #tpu.memory_space<vmem>>) attributes {dimension_semantics = [#tpu.dimension_semantics<parallel>], iteration_bounds = array<i64: 1>, scalar_prefetch = 0 : i64, scratch_operands = 0 : i64, tpu.core_type = #tpu.core_type<tc>, window_params = [{transform_indices = @transform_0, window_bounds = array<i64: 4, 4>}, {transform_indices = @transform_1, window_bounds = array<i64: 4, 4>}, {pipeline_mode = #tpu.pipeline_mode<synchronous>, transform_indices = @transform_2, window_bounds = array<i64: 4, 128>}, {pipeline_mode = #tpu.pipeline_mode<synchronous>, transform_indices = @transform_3, window_bounds = array<i64: 4, 128>}, {pipeline_mode = #tpu.pipeline_mode<synchronous>, transform_indices = @transform_4, window_bounds = array<i64: 1, 128>}, {transform_indices = @transform_5, window_bounds = array<i64: 4, 128>}]} {
    %c0 = arith.constant 0 : index
    %c0_0 = arith.constant 0 : index
    %0 = vector.load %arg1[%c0, %c0_0] : memref<4x4xf32, #tpu.memory_space<vmem>>, vector<4x4xf32>
    %c0_1 = arith.constant 0 : index
    %c0_2 = arith.constant 0 : index
    %1 = vector.load %arg3[%c0_1, %c0_2] : memref<4x128xf32, #tpu.memory_space<vmem>>, vector<4x128xf32>
    %2 = vector.extract_strided_slice %0 {offsets = [0, 0], sizes = [4, 1], strides = [1, 1]} : vector<4x4xf32> to vector<4x1xf32>
    %3 = vector.extract_strided_slice %1 {offsets = [0, 0], sizes = [1, 128], strides = [1, 1]} : vector<4x128xf32> to vector<1x128xf32>
    %4 = vector.broadcast %2 : vector<4x1xf32> to vector<4x128xf32>
    %5 = vector.broadcast %3 : vector<1x128xf32> to vector<4x128xf32>
    %6 = arith.mulf %4, %5 : vector<4x128xf32>
    %7 = vector.extract_strided_slice %0 {offsets = [0, 1], sizes = [4, 1], strides = [1, 1]} : vector<4x4xf32> to vector<4x1xf32>
    %8 = vector.extract_strided_slice %1 {offsets = [1, 0], sizes = [1, 128], strides = [1, 1]} : vector<4x128xf32> to vector<1x128xf32>
    %9 = vector.broadcast %7 : vector<4x1xf32> to vector<4x128xf32>
    %10 = vector.broadcast %8 : vector<1x128xf32> to vector<4x128xf32>
    %11 = arith.mulf %9, %10 : vector<4x128xf32>
    %12 = arith.addf %6, %11 : vector<4x128xf32>
    %13 = vector.extract_strided_slice %0 {offsets = [0, 2], sizes = [4, 1], strides = [1, 1]} : vector<4x4xf32> to vector<4x1xf32>
    %14 = vector.extract_strided_slice %1 {offsets = [2, 0], sizes = [1, 128], strides = [1, 1]} : vector<4x128xf32> to vector<1x128xf32>
    %15 = vector.broadcast %13 : vector<4x1xf32> to vector<4x128xf32>
    %16 = vector.broadcast %14 : vector<1x128xf32> to vector<4x128xf32>
    %17 = arith.mulf %15, %16 : vector<4x128xf32>
    %18 = arith.addf %12, %17 : vector<4x128xf32>
    %19 = vector.extract_strided_slice %0 {offsets = [0, 3], sizes = [4, 1], strides = [1, 1]} : vector<4x4xf32> to vector<4x1xf32>
    %20 = vector.extract_strided_slice %1 {offsets = [3, 0], sizes = [1, 128], strides = [1, 1]} : vector<4x128xf32> to vector<1x128xf32>
    %21 = vector.broadcast %19 : vector<4x1xf32> to vector<4x128xf32>
    %22 = vector.broadcast %20 : vector<1x128xf32> to vector<4x128xf32>
    %23 = arith.mulf %21, %22 : vector<4x128xf32>
    %24 = arith.addf %18, %23 : vector<4x128xf32>
    %c0_3 = arith.constant 0 : index
    %c0_4 = arith.constant 0 : index
    %25 = vector.load %arg5[%c0_3, %c0_4] : memref<1x128xf32, #tpu.memory_space<vmem>>, vector<1x128xf32>
    %26 = vector.broadcast %25 : vector<1x128xf32> to vector<4x128xf32>
    %27 = arith.addf %24, %26 : vector<4x128xf32>
    %28 = math.sin %27 : vector<4x128xf32>
    %c0_5 = arith.constant 0 : index
    %c0_6 = arith.constant 0 : index
    %29 = vector.load %arg2[%c0_5, %c0_6] : memref<4x4xf32, #tpu.memory_space<vmem>>, vector<4x4xf32>
    %c0_7 = arith.constant 0 : index
    %c0_8 = arith.constant 0 : index
    %30 = vector.load %arg4[%c0_7, %c0_8] : memref<4x128xf32, #tpu.memory_space<vmem>>, vector<4x128xf32>
    %31 = vector.extract_strided_slice %29 {offsets = [0, 0], sizes = [4, 1], strides = [1, 1]} : vector<4x4xf32> to vector<4x1xf32>
    %32 = vector.extract_strided_slice %30 {offsets = [0, 0], sizes = [1, 128], strides = [1, 1]} : vector<4x128xf32> to vector<1x128xf32>
    %33 = vector.broadcast %31 : vector<4x1xf32> to vector<4x128xf32>
    %34 = vector.broadcast %32 : vector<1x128xf32> to vector<4x128xf32>
    %35 = arith.mulf %33, %34 : vector<4x128xf32>
    %36 = vector.extract_strided_slice %29 {offsets = [0, 1], sizes = [4, 1], strides = [1, 1]} : vector<4x4xf32> to vector<4x1xf32>
    %37 = vector.extract_strided_slice %30 {offsets = [1, 0], sizes = [1, 128], strides = [1, 1]} : vector<4x128xf32> to vector<1x128xf32>
    %38 = vector.broadcast %36 : vector<4x1xf32> to vector<4x128xf32>
    %39 = vector.broadcast %37 : vector<1x128xf32> to vector<4x128xf32>
    %40 = arith.mulf %38, %39 : vector<4x128xf32>
    %41 = arith.addf %35, %40 : vector<4x128xf32>
    %42 = vector.extract_strided_slice %29 {offsets = [0, 2], sizes = [4, 1], strides = [1, 1]} : vector<4x4xf32> to vector<4x1xf32>
    %43 = vector.extract_strided_slice %30 {offsets = [2, 0], sizes = [1, 128], strides = [1, 1]} : vector<4x128xf32> to vector<1x128xf32>
    %44 = vector.broadcast %42 : vector<4x1xf32> to vector<4x128xf32>
    %45 = vector.broadcast %43 : vector<1x128xf32> to vector<4x128xf32>
    %46 = arith.mulf %44, %45 : vector<4x128xf32>
    %47 = arith.addf %41, %46 : vector<4x128xf32>
    %48 = vector.extract_strided_slice %29 {offsets = [0, 3], sizes = [4, 1], strides = [1, 1]} : vector<4x4xf32> to vector<4x1xf32>
    %49 = vector.extract_strided_slice %30 {offsets = [3, 0], sizes = [1, 128], strides = [1, 1]} : vector<4x128xf32> to vector<1x128xf32>
    %50 = vector.broadcast %48 : vector<4x1xf32> to vector<4x128xf32>
    %51 = vector.broadcast %49 : vector<1x128xf32> to vector<4x128xf32>
    %52 = arith.mulf %50, %51 : vector<4x128xf32>
    %53 = arith.addf %47, %52 : vector<4x128xf32>
    %c0_9 = arith.constant 0 : index
    %c0_10 = arith.constant 0 : index
    %54 = vector.load %arg5[%c0_9, %c0_10] : memref<1x128xf32, #tpu.memory_space<vmem>>, vector<1x128xf32>
    %55 = vector.broadcast %54 : vector<1x128xf32> to vector<4x128xf32>
    %56 = arith.addf %53, %55 : vector<4x128xf32>
    %57 = math.sin %56 : vector<4x128xf32>
    %58 = arith.addf %28, %57 : vector<4x128xf32>
    %c0_11 = arith.constant 0 : index
    %c0_12 = arith.constant 0 : index
    %59 = vector.load %arg6[%c0_11, %c0_12] : memref<4x128xf32, #tpu.memory_space<vmem>>, vector<4x128xf32>
    tpu.vector_store %arg6[%c0_11, %c0_12], %58 {strides = array<i32>} : memref<4x128xf32, #tpu.memory_space<vmem>>, vector<4x128xf32>,
    return
  }
  func.func @transform_0(%arg0: i32) -> (i32, i32) {
    %c0_i32 = arith.constant 0 : i32
    %c0_i32_0 = arith.constant 0 : i32
    return %arg0, %c0_i32 : i32, i32
  }
  func.func @transform_1(%arg0: i32) -> (i32, i32) {
    %c0_i32 = arith.constant 0 : i32
    %c0_i32_0 = arith.constant 0 : i32
    return %arg0, %c0_i32 : i32, i32
  }
  func.func @transform_2(%arg0: i32) -> (i32, i32) {
    %c0_i32 = arith.constant 0 : i32
    %c0_i32_0 = arith.constant 0 : i32
    %c0_i32_1 = arith.constant 0 : i32
    return %c0_i32, %c0_i32_0 : i32, i32
  }
  func.func @transform_3(%arg0: i32) -> (i32, i32) {
    %c0_i32 = arith.constant 0 : i32
    %c0_i32_0 = arith.constant 0 : i32
    %c0_i32_1 = arith.constant 0 : i32
    return %c0_i32, %c0_i32_0 : i32, i32
  }
  func.func @transform_4(%arg0: i32) -> (i32, i32) {
    %c0_i32 = arith.constant 0 : i32
    %c0_i32_0 = arith.constant 0 : i32
    %c0_i32_1 = arith.constant 0 : i32
    return %c0_i32, %c0_i32_0 : i32, i32
  }
  func.func @transform_5(%arg0: i32) -> (i32, i32) {
    %c0_i32 = arith.constant 0 : i32
    %c0_i32_0 = arith.constant 0 : i32
    return %arg0, %c0_i32 : i32, i32
  }
}

</mosaic_0001>

<bundles_post_ra>
// kernel: tpu_custom_call.1
= control target key start
LH: loop header
LB: loop body
LE: loop exit
PB: predicated region body
PF: predicated region fallthrough
CT: control target
= control target key end

     0   :  { %10 = vsyncpa [#allocation3], 0  ;;  %s663_s0 = inlined_call_operand.hbm [shape: f32[4,4], index: 0, kind: input, shape index: {}]   ;;  %s664_s1 = inlined_call_operand.hbm [shape: f32[4,4], index: 1, kind: input, shape index: {}]   ;;  %s665_s2 = inlined_call_operand.vmem [shape: f32[4,128], index: 2, kind: input, shape index: {}]   ;;  %s666_s3 = inlined_call_operand.vmem [shape: f32[4,128], index: 3, kind: input, shape index: {}]   ;;  %s667_s4 = inlined_call_operand.vmem [shape: f32[1,128], index: 4, kind: input, shape index: {}]   ;;  %s668_s5 = inlined_call_operand.hbm [shape: f32[4,128], index: 5, kind: output, shape index: {}]  }
   0x1   :  { %11 = vsyncpa [#allocation6], 0 }
   0x2   :  { %12 = vsyncpa [#allocation4], 0  ;;  %s482_s18 = smov [#allocation2]   ;;  %s483_s20 = smov [#allocation5]  }
   0x3   :  { %s19_s19 = sshll.u32 %s482_s18, 4  ;;  %s29_s21 = sshll.u32 %s483_s20, 4  ;;  %s20_s19 = int_to_ptr.vmem [resolvable:$true] %s19_s19  ;;  %s30_s21 = int_to_ptr.vmem [resolvable:$true] %s29_s21 }
   0x4   :  { %s410_s24 = scalar_lea.hbm %s663_s0, 64 }
   0x5   :  { %p411_p0 = scmp.ne.s32.totalorder %s663_s0, %s410_s24  ;;  %p414_p1 = scmp.lt.u32.totalorder %s410_s24, %s663_s0 }
   0x7   :  { %p416_p2 = pnand %p414_p1, %p411_p0 }
   0x9   :  { %419 = shalt.err (!%p416_p2)
}
   0xa   :  { %s420_s29 = scalar_lea.vmem %s20_s19, 64  ;;  %p425_p4 = scmp.lt.s32.totalorder %s20_s19, %s20_s19 }
   0xb   :  { %p421_p3 = scmp.ne.s32.totalorder %s20_s19, %s420_s29  ;;  %p426_p5 = scmp.lt.s32.totalorder %s420_s29, %s420_s29 }
   0xd   :  { %p427_p6 = por %p426_p5, %p425_p4 }
   0xf   :  { %p428_p7 = pnand %p427_p6, %p421_p3 }
  0x11   :  { %431 = shalt.err (!%p428_p7)
}
  0x12   :  { %22 = dma.hbm_to_vmem [thread:$0]  %s663_s0, 64, %s20_s19, [#allocation3]  }
  0x13   :  { %s432_s9 = scalar_lea.hbm %s664_s1, 64 }
  0x14   :  { %p433_p8 = scmp.ne.s32.totalorder %s664_s1, %s432_s9  ;;  %p436_p9 = scmp.lt.u32.totalorder %s432_s9, %s664_s1 }
  0x16   :  { %p438_p10 = pnand %p436_p9, %p433_p8 }
  0x18   :  { %441 = shalt.err (!%p438_p10)
}
  0x19   :  { %s442_s14 = scalar_lea.vmem %s30_s21, 64  ;;  %p447_p12 = scmp.lt.s32.totalorder %s30_s21, %s30_s21 }
  0x1a   :  { %p443_p11 = scmp.ne.s32.totalorder %s30_s21, %s442_s14  ;;  %p448_p13 = scmp.lt.s32.totalorder %s442_s14, %s442_s14 }
  0x1c   :  { %p449_p0 = por %p448_p13, %p447_p12 }
  0x1e   :  { %p450_p1 = pnand %p449_p0, %p443_p11 }
  0x20   :  { %453 = shalt.err (!%p450_p1)
}
  0x21   :  { %32 = dma.hbm_to_vmem [thread:$0]  %s664_s1, 64, %s30_s21, [#allocation6]  }
  0x22   :  { %476 = dma.done.wait [#allocation3], 64  }
  0x23   :  { %477 = vsyncadd [#allocation3], 4294967232 }
  0x24   :  { %478 = dma.done.wait [#allocation6], 64  }
  0x25   :  { %479 = vsyncadd [#allocation6], 4294967232  ;;  %v484_v0 = vmov 0   ;;  %v199_v1 = vld [vmem:[#allocation5] sm:$0xf]  ;;  %v485_v3 = vmov 1   ;;  %v52_v6 = vlaneseq }
  0x26   :  { %396 = vset.pattern.permute.xlu1 %v484_v0  ;;  %394 = vset.pattern.permute.xlu0 %v484_v0  ;;  %v45_v2 = vld [vmem:[#allocation2] sm:$0xf]  ;;  %v486_v4 = vmov 2   ;;  %v487_v5 = vmov 3  }
  0x27   :  { %203 = vperm.xlu1 %396, %v199_v1   ;;  %49 = vperm.xlu0 %394, %v45_v2   ;;  %v53_v7 = vshrl.u32 %v52_v6, 7  ;;  %v46_v10 = vld [vmem:[%s665_s2] sm:$0xf] }
  0x28   :  { %v200_v18 = vld [vmem:[%s666_s3] sm:$0xf] }
  0x29   :  { %v54_v11 = vsub.s32 0, %v53_v7  ;;  %v63_v12 = vsub.s32 1, %v53_v7  ;;  %v73_v15 = vsub.s32 2, %v53_v7  ;;  %v83_v22 = vsub.s32 3, %v53_v7  ;;  %v364_v38 = vld [vmem:[%s667_s4] ss:$0 sm:$0xff] }
  0x2a   :  { %v490_v7 = vmov 1326507024   ;;  %s494_s4 = smov [#allocation7]  }
  0x2b   :  { %397 = vset.pattern.permute.xlu1 %v485_v3  ;;  %395 = vset.pattern.permute.xlu0 %v485_v3  ;;  %v55_v13 = vrot.slane %v46_v10, %v54_v11  ;;  %v64_v14 = vrot.slane %v46_v10, %v63_v12  ;;  %v74_v21 = vrot.slane %v46_v10, %v73_v15  ;;  %v489_v3 = vmov 920167782   ;;  %s354_s19 = sshll.u32 %s494_s4, 4  ;;  %s355_s19 = int_to_ptr.vmem [resolvable:$true] %s354_s19 }
  0x2c   :  { %212 = vperm.xlu1 %397, %v199_v1   ;;  %58 = vperm.xlu0 %395, %v45_v2   ;;  %v218_v23 = vrot.slane %v200_v18, %v63_v12  ;;  %v209_v25 = vrot.slane %v200_v18, %v54_v11  ;;  %v228_v28 = vrot.slane %v200_v18, %v73_v15  ;;  %v491_v11 = vmov 683565275   ;;  %s454_s20 = scalar_lea.vmem %s355_s19, 64  ;;  %p459_p3 = scmp.lt.s32.totalorder %s355_s19, %s355_s19 }
  0x2d   :  { %v84_v29 = vrot.slane %v46_v10, %v83_v22  ;;  %v238_v33 = vrot.slane %v200_v18, %v83_v22  ;;  %v493_v15 = vmov 2131351028   ;;  %p455_p2 = scmp.ne.s32.totalorder %s355_s19, %s454_s20  ;;  %p460_p4 = scmp.lt.s32.totalorder %s454_s20, %s454_s20 }
  0x2f   :  { %p461_p5 = por %p460_p4, %p459_p3 }
  0x30   :  { %398 = vset.pattern.permute.xlu1 %v486_v4  ;;  %399 = vset.pattern.permute.xlu0 %v486_v4 }
  0x31   :  { %68 = vperm.xlu1 %398, %v45_v2   ;;  %222 = vperm.xlu0 %399, %v199_v1   ;;  %p462_p6 = pnand %p461_p5, %p455_p2 }
  0x35   :  { %400 = vset.pattern.permute.xlu1 %v487_v5  ;;  %401 = vset.pattern.permute.xlu0 %v487_v5 }
  0x36   :  { %78 = vperm.xlu1 %400, %v45_v2  }
  0x3a   :  { %232 = vperm.xlu1 %400, %v199_v1   ;;  %v488_v1 = vmov 2102212464  }
  0xa6   :  { %v204_v8 = vpop.permute.xlu1 %203  ;;  %v50_v9 = vpop.permute.xlu0 %49 }
  0xa7   :  { %v56_v19 = vmul.f32 %v55_v13, %v50_v9  ;;  %v210_v34 = vmul.f32 %v209_v25, %v204_v8  ;;  %v492_v13 = vmov 2475754826  }
  0xab   :  { %v213_v16 = vpop.permute.xlu1 %212  ;;  %v59_v17 = vpop.permute.xlu0 %58 }
  0xac   :  { %v65_v20 = vmul.f32 %v64_v14, %v59_v17  ;;  %v219_v31 = vmul.f32 %v218_v23, %v213_v16 }
  0xae   :  { %v66_v26 = vadd.f32 %v65_v20, %v56_v19  ;;  %v220_v39 = vadd.f32 %v219_v31, %v210_v34 }
  0xb0   :  { %v69_v24 = vpop.permute.xlu1 %68  ;;  %v223_v30 = vpop.permute.xlu0 %222 }
  0xb1   :  { %v75_v27 = vmul.f32 %v74_v21, %v69_v24  ;;  %v229_v36 = vmul.f32 %v228_v28, %v223_v30 }
  0xb3   :  { %v76_v35 = vadd.f32 %v75_v27, %v66_v26  ;;  %v230_v42 = vadd.f32 %v229_v36, %v220_v39 }
  0xb5   :  { %v79_v32 = vpop.permute.xlu1 %78 }
  0xb6   :  { %v85_v37 = vmul.f32 %v84_v29, %v79_v32 }
  0xb8   :  { %v86_v40 = vadd.f32 %v85_v37, %v76_v35 }
  0xb9   :  { %v233_v41 = vpop.permute.xlu1 %232 }
  0xba   :  { %v558_v43 = vadd.f32 %v364_v38, %v86_v40  ;;  %v239_v44 = vmul.f32 %v238_v33, %v233_v41 }
  0xbc   :  { %v98_v45 = vand.u32 2139095040, %v558_v43  ;;  %v240_v46 = vadd.f32 %v239_v44, %v230_v42  ;;  %v95_v47 = vand.u32 2147483647, %v558_v43  ;;  %vm97_vm14 = vcmp.lt.s32.totalorder %v558_v43, 0 }
  0xbe   :  { %v99_v48 = vshrl.u32 %v98_v45, 23  ;;  %v562_v49 = vadd.f32 %v364_v38, %v240_v46  ;;  %v102_v52 = vand.u32 8388607, %v95_v47  ;;  %vm634_vm15 = vcmp.le.f32.partialorder %v95_v47, 0.7853982 }
  0xc0   :  { %v365_v50 = vadd.s32 4294967169, %v99_v48  ;;  %v245_v51 = vand.u32 2139095040, %v562_v49  ;;  %v242_v53 = vand.u32 2147483647, %v562_v49  ;;  %v103_v57 = vor.u32 8388608, %v102_v52 }
  0xc2   :  { %v105_v54 = vadd.s32 1, %v365_v50  ;;  %v246_v55 = vshrl.u32 %v245_v51, 23  ;;  %v570_v59 = vand.u32 8388607, %v242_v53  ;;  %v572_v0 = vshll.u32 %v103_v57, 8 }
  0xc4   :  { %vm106_vm0 = vcmp.gt.s32.totalorder %v105_v54, 0  ;;  %v369_v56 = vadd.s32 4294967169, %v246_v55  ;;  %v250_v5 = vor.u32 8388608, %v570_v59 }
  0xc5   :  { %v107_v58 = vsel %vm106_vm0, %v105_v54, 0  ;;  %vm244_vm0 = vcmp.lt.s32.totalorder %v562_v49, 0 }
  0xc6   :  { %v108_v60 = vshrl.u32 %v107_v58, 5  ;;  %v109_v61 = vand.u32 31, %v107_v58  ;;  %v252_v62 = vadd.s32 1, %v369_v56 }
  0xc8   :  { %v110_v63 = vsub.s32 32, %v109_v61  ;;  %v121_v2 = vshll.u32 %v488_v1, %v109_v61  ;;  %v124_v4 = vshll.u32 %v489_v3, %v109_v61  ;;  %vm253_vm1 = vcmp.gt.s32.totalorder %v252_v62, 0 }
  0xc9   :  { %vm130_vm2 = vcmp.lt.s32.totalorder %v108_v60, 4  ;;  %v254_v9 = vsel %vm253_vm1, %v252_v62, 0  ;;  %v112_v12 = vshll.u32 %v491_v11, %v109_v61  ;;  %v115_v19 = vshll.u32 %v492_v13, %v109_v61 }
  0xca   :  { %v122_v6 = vshrl.u32 %v489_v3, %v110_v63  ;;  %v125_v8 = vshrl.u32 %v490_v7, %v110_v63  ;;  %v256_v10 = vand.u32 31, %v254_v9  ;;  %v113_v14 = vshrl.u32 %v492_v13, %v110_v63 }
  0xcb   :  { %v116_v16 = vshrl.u32 %v493_v15, %v110_v63  ;;  %v119_v20 = vshrl.u32 %v488_v1, %v110_v63  ;;  %v576_v21 = vshrl.u32 %v254_v9, 5  ;;  %v118_v23 = vshll.u32 %v493_v15, %v109_v61 }
  0xcc   :  { %v123_v17 = vor.u32 %v122_v6, %v121_v2  ;;  %v126_v18 = vor.u32 %v125_v8, %v124_v4  ;;  %v257_v22 = vsub.s32 32, %v256_v10  ;;  %vm127_vm3 = vcmp.lt.s32.totalorder %v108_v60, 1 }
  0xcd   :  { %v271_v25 = vshll.u32 %v489_v3, %v256_v10  ;;  %v114_v26 = vor.u32 %v113_v14, %v112_v12  ;;  %v117_v27 = vor.u32 %v116_v16, %v115_v19  ;;  %v120_v31 = vor.u32 %v119_v20, %v118_v23 }
  0xce   :  { %v136_v24 = vsel %vm130_vm2, %v123_v17, 920167782  ;;  %v140_v28 = vsel %vm130_vm2, %v126_v18, 1326507024  ;;  %v269_v29 = vshrl.u32 %v489_v3, %v257_v22  ;;  %v272_v30 = vshrl.u32 %v490_v7, %v257_v22 }
  0xcf   :  { %v268_v32 = vshll.u32 %v488_v1, %v256_v10  ;;  %v111_v33 = vshrl.u32 %v491_v11, %v110_v63  ;;  %vm129_vm4 = vcmp.lt.s32.totalorder %v108_v60, 3  ;;  %v135_v34 = vsel %vm127_vm3, %v114_v26, %v117_v27 }
  0xd0   :  { %v273_v35 = vor.u32 %v272_v30, %v271_v25  ;;  %vm128_vm5 = vcmp.lt.s32.totalorder %v108_v60, 2  ;;  %v132_v36 = vsel %vm130_vm2, %v120_v31, 2102212464  ;;  %v137_v37 = vsel %vm129_vm4, %v120_v31, %v136_v24 }
  0xd1   :  { %vm277_vm6 = vcmp.lt.s32.totalorder %v576_v21, 4  ;;  %v138_v38 = vsel %vm128_vm5, %v135_v34, %v137_v37  ;;  %v139_v39 = vsel %vm127_vm3, %v117_v27, %v120_v31  ;;  %v141_v40 = vsel %vm129_vm4, %v123_v17, %v140_v28 }
  0xd2   :  { %v270_v41 = vor.u32 %v269_v29, %v268_v32  ;;  %v131_v42 = vsel %vm127_vm3, %v111_v33, %v114_v26  ;;  %v133_v44 = vsel %vm129_vm4, %v117_v27, %v132_v36  ;;  %v142_v45 = vsel %vm128_vm5, %v139_v39, %v141_v40 }
  0xd3   :  { %v589_v46 = vmul.u32.u64.low %v572_v0, %v142_v45  ;;  %v590_v48 = vmul.u32.u64.high %v572_v0, %v142_v45, %v589_v46  ;;  %v593_v50 = vmul.u32.u64.low %v572_v0, %v138_v38  ;;  %v594_v51 = vmul.u32.u64.high %v572_v0, %v138_v38, %v593_v50 }
  0xd4   :  { %v287_v52 = vsel %vm277_vm6, %v273_v35, 1326507024  ;;  %v259_v54 = vshll.u32 %v491_v11, %v256_v10  ;;  %v260_v55 = vshrl.u32 %v492_v13, %v257_v22  ;;  %v134_v56 = vsel %vm128_vm5, %v131_v42, %v133_v44 }
  0xd5   :  { %v262_v57 = vshll.u32 %v492_v13, %v256_v10  ;;  %v263_v58 = vshrl.u32 %v493_v15, %v257_v22  ;;  %v266_v59 = vshrl.u32 %v488_v1, %v257_v22  ;;  %v283_v61 = vsel %vm277_vm6, %v270_v41, 920167782 }
  0xd6   :  { %v261_v62 = vor.u32 %v260_v55, %v259_v54  ;;  %v265_v63 = vshll.u32 %v493_v15, %v256_v10  ;;  %v290_v2 = vshll.u32 %v250_v5, 8  ;;  %vm152_vm7 = vc.u32 %v590_v48, %v593_v50 }
  0xd7   :  { %v153_v3 = vadd.s32 1, %v594_v51  ;;  %v264_v4 = vor.u32 %v263_v58, %v262_v57  ;;  %vm276_vm8 = vcmp.lt.s32.totalorder %v576_v21, 3  ;;  %v150_v6 = vmul.u32 %v572_v0, %v134_v56 }
  0xd8   :  { %v267_v60 = vor.u32 %v266_v59, %v265_v63  ;;  %vm274_vm9 = vcmp.lt.s32.totalorder %v576_v21, 1  ;;  %v288_v1 = vsel %vm276_vm8, %v270_v41, %v287_v52  ;;  %v258_v8 = vshrl.u32 %v491_v11, %v257_v22 }
  0xd9   :  { %v154_v7 = vsel %vm152_vm7, %v153_v3, %v594_v51  ;;  %vm275_vm10 = vcmp.lt.s32.totalorder %v576_v21, 2  ;;  %v282_v5 = vsel %vm274_vm9, %v261_v62, %v264_v4  ;;  %v151_v38 = vadd.s32 %v593_v50, %v590_v48 }
  0xda   :  { %v155_v9 = vadd.s32 %v154_v7, %v150_v6  ;;  %v279_v10 = vsel %vm277_vm6, %v267_v60, 2102212464  ;;  %v284_v0 = vsel %vm276_vm8, %v267_v60, %v283_v61  ;;  %v286_v12 = vsel %vm274_vm9, %v264_v4, %v267_v60 }
  0xdb   :  { %v278_v13 = vsel %vm274_vm9, %v258_v8, %v261_v62  ;;  %v285_v14 = vsel %vm275_vm10, %v282_v5, %v284_v0  ;;  %v289_v15 = vsel %vm275_vm10, %v286_v12, %v288_v1  ;;  %v280_v17 = vsel %vm276_vm8, %v264_v4, %v279_v10 }
  0xdc   :  { %v156_v16 = vadd.s32 536870912, %v155_v9  ;;  %v618_v18 = vmul.u32.u64.low %v290_v2, %v289_v15  ;;  %v619_v11 = vmul.u32.u64.high %v290_v2, %v289_v15, %v618_v18  ;;  %v281_v23 = vsel %vm275_vm10, %v278_v13, %v280_v17 }
  0xdd   :  { %v621_v19 = vmul.u32.u64.low %v290_v2, %v285_v14  ;;  %v622_v20 = vmul.u32.u64.high %v290_v2, %v285_v14, %v621_v19  ;;  %v297_v27 = vmul.u32 %v290_v2, %v281_v23  ;;  %vm243_vm1 = vcmp.le.f32.partialorder %v242_v53, 0.7853982 }
  0xde   :  { %v157_v22 = vshrl.u32 %v156_v16, 30  ;;  %vm187_vm8 = vweird.f32 %v558_v43  ;;  %vm334_vm9 = vweird.f32 %v562_v49 }
  0xdf   :  { %vm299_vm11 = vc.u32 %v619_v11, %v621_v19  ;;  %v300_v25 = vadd.s32 1, %v622_v20  ;;  %v298_v62 = vadd.s32 %v621_v19, %v619_v11 }
  0xe0   :  { %v158_v24 = vshll.u32 %v157_v22, 30 }
  0xe1   :  { %v301_v28 = vsel %vm299_vm11, %v300_v25, %v622_v20 }
  0xe2   :  { %v159_v26 = vsub.s32 %v155_v9, %v158_v24  ;;  %v302_v21 = vadd.s32 %v301_v28, %v297_v27  ;;  %v181_v9 = vsub.s32 4, %v157_v22 }
  0xe4   :  { %v161_v29 = vsub.s32 0, %v159_v26  ;;  %v303_v31 = vadd.s32 536870912, %v302_v21  ;;  %v182_v47 = vsel %vm97_vm14, %v181_v9, %v157_v22 }
  0xe5   :  { %v184_v15 = vsel %vm634_vm15, 0, %v182_v47 }
  0xe6   :  { %v366_v30 = vmin.u32 %v161_v29, %v159_v26  ;;  %v304_v33 = vshrl.u32 %v303_v31, 30  ;;  %v188_v11 = vadd.s32 3, %v184_v15 }
  0xe8   :  { %v163_v32 = vclz %v366_v30  ;;  %v305_v35 = vshll.u32 %v304_v33, 30  ;;  %v328_v13 = vsub.s32 4, %v304_v33  ;;  %v189_v24 = vand.u32 3, %v188_v11 }
  0xea   :  { %v367_v34 = vadd.s32 4294967294, %v163_v32  ;;  %v306_v37 = vsub.s32 %v302_v21, %v305_v35  ;;  %v329_v17 = vsel %vm244_vm0, %v328_v13, %v304_v33  ;;  %vm191_vm2 = vcmp.eq.s32.totalorder %v189_v24, 0 }
  0xeb   :  { %v331_v19 = vsel %vm243_vm1, 0, %v329_v17  ;;  %vm194_vm3 = vcmp.eq.s32.totalorder %v189_v24, 2  ;;  %vm190_vm4 = vcmp.lt.s32.totalorder %v189_v24, 2 }
  0xec   :  { %vm368_vm12 = vcmp.lt.s32.totalorder %v367_v34, 0  ;;  %v308_v41 = vsub.s32 0, %v306_v37  ;;  %v335_v22 = vadd.s32 3, %v331_v19 }
  0xed   :  { %v166_v36 = vsel %vm368_vm12, 0, %v367_v34 }
  0xee   :  { %v167_v39 = vsub.s32 32, %v166_v36  ;;  %v171_v40 = vsub.s32 4294967266, %v166_v36  ;;  %v168_v42 = vshll.u32 %v159_v26, %v166_v36  ;;  %v370_v46 = vmin.u32 %v308_v41, %v306_v37 }
  0xef   :  { %v336_v27 = vand.u32 3, %v335_v22 }
  0xf0   :  { %v169_v44 = vshrl.u32 %v151_v38, %v167_v39  ;;  %v172_v45 = vadd.s32 127, %v171_v40  ;;  %v310_v54 = vclz %v370_v46 }
  0xf1   :  { %vm341_vm5 = vcmp.eq.s32.totalorder %v336_v27, 2  ;;  %vm338_vm6 = vcmp.eq.s32.totalorder %v336_v27, 0  ;;  %vm337_vm7 = vcmp.lt.s32.totalorder %v336_v27, 2 }
  0xf2   :  { %v170_v51 = vor.u32 %v169_v44, %v168_v42  ;;  %v173_v52 = vshll.u32 %v172_v45, 23  ;;  %v371_v56 = vadd.s32 4294967294, %v310_v54 }
  0xf4   :  { %v174_v55 = vor.u32 4788187, %v173_v52  ;;  %v177_v58 = vcvt.s32.f32 %v170_v51  ;;  %vm372_vm13 = vcmp.lt.s32.totalorder %v371_v56, 0 }
  0xf5   :  { %v313_v61 = vsel %vm372_vm13, 0, %v371_v56 }
  0xf6   :  { %v175_v57 = vand.u32 2147483647, %v174_v55  ;;  %v314_v48 = vsub.s32 32, %v313_v61  ;;  %v318_v50 = vsub.s32 4294967266, %v313_v61  ;;  %v315_v2 = vshll.u32 %v306_v37, %v313_v61 }
  0xf8   :  { %v178_v59 = vmul.f32 %v177_v58, %v175_v57  ;;  %v316_v3 = vshrl.u32 %v298_v62, %v314_v48  ;;  %v319_v4 = vadd.s32 127, %v318_v50 }
  0xfa   :  { %v179_v63 = vxor.u32 2147483648, %v178_v59  ;;  %v317_v1 = vor.u32 %v316_v3, %v315_v2  ;;  %v320_v7 = vshll.u32 %v319_v4, 23 }
  0xfc   :  { %v180_v6 = vsel %vm97_vm14, %v179_v63, %v178_v59  ;;  %v321_v5 = vor.u32 4788187, %v320_v7  ;;  %v324_v0 = vcvt.s32.f32 %v317_v1 }
  0xfd   :  { %v183_v8 = vsel %vm634_vm15, %v558_v43, %v180_v6 }
  0xfe   :  { %402 = vcosq.f32 %v183_v8  ;;  %v322_v10 = vand.u32 2147483647, %v321_v5 }
  0xff   :  { %404 = vsinq.f32 %v183_v8 }
 0x100   :  { %v325_v12 = vmul.f32 %v324_v0, %v322_v10 }
 0x102   :  { %v326_v14 = vxor.u32 2147483648, %v325_v12 }
 0x104   :  { %v327_v16 = vsel %vm244_vm0, %v326_v14, %v325_v12 }
 0x105   :  { %v330_v18 = vsel %vm243_vm1, %v562_v49, %v327_v16 }
 0x106   :  { %406 = vcosq.f32 %v330_v18 }
 0x107   :  { %408 = vsinq.f32 %v330_v18 }
 0x108   :  { %v403_v20 = vpop.eup %402 }
 0x109   :  { %v405_v23 = vpop.eup %404  ;;  %v195_v26 = vxor.u32 2147483648, %v403_v20 }
 0x10a   :  { %v192_v25 = vxor.u32 2147483648, %v405_v23 }
 0x10b   :  { %v196_v53 = vsel %vm194_vm3, %v195_v26, %v405_v23 }
 0x10c   :  { %v193_v29 = vsel %vm191_vm2, %v403_v20, %v192_v25 }
 0x10d   :  { %v197_v32 = vsel %vm190_vm4, %v193_v29, %v196_v53 }
 0x10e   :  { %v198_v36 = vsel %vm187_vm8, nan, %v197_v32 }
 0x110   :  { %v407_v28 = vpop.eup %406 }
 0x111   :  { %v409_v21 = vpop.eup %408  ;;  %v342_v30 = vxor.u32 2147483648, %v407_v28 }
 0x112   :  { %v339_v31 = vxor.u32 2147483648, %v409_v21 }
 0x113   :  { %v343_v33 = vsel %vm341_vm5, %v342_v30, %v409_v21 }
 0x114   :  { %v340_v34 = vsel %vm338_vm6, %v407_v28, %v339_v31 }
 0x115   :  { %v344_v35 = vsel %vm337_vm7, %v340_v34, %v343_v33 }
 0x116   :  { %v345_v37 = vsel %vm334_vm9, nan, %v344_v35 }
 0x117   :  { %v346_v38 = vadd.f32 %v345_v37, %v198_v36 }
 0x119   :  { %347 = vst [vmem:[#allocation7] sm:$0xf] %v346_v38 }
 0x11a   :  { %465 = shalt.err (!%p462_p6)
}
 0x11b   :  { %s466_s23 = scalar_lea.hbm %s668_s5, 64 }
 0x11c   :  { %p467_p7 = scmp.ne.s32.totalorder %s668_s5, %s466_s23  ;;  %p470_p8 = scmp.lt.u32.totalorder %s466_s23, %s668_s5 }
 0x11e   :  { %p472_p9 = pnand %p470_p8, %p467_p7 }
 0x120   :  { %475 = shalt.err (!%p472_p9)
}
 0x121   :  { %357 = dma.vmem_to_hbm [thread:$0]  %s355_s19, 64, %s668_s5, [#allocation4]  }
 0x122   :  { %480 = dma.done.wait [#allocation4], 64  }
 0x123   :  { %481 = vsyncadd [#allocation4], 4294967232 }
 0x124   :  { %361 = vsyncpa [#allocation3], 1 }
 0x125   :  { %362 = vsyncpa [#allocation6], 1 }
 0x126   :  { %363 = vsyncpa [#allocation4], 1 }

</bundles_post_ra>
